<compile_context>
chip_gen: v6e
topology: v6e:2x2x1
jax: 0.10.0
libtpu: 0.0.40
codegen_flags: <defaults>
</compile_context>

<pallas_src>
import functools

import jax
import jax.numpy as jnp
import numpy as np
from jax import lax
from jax.experimental import pallas as pl
from jax.experimental.pallas import tpu as pltpu


def _bilstm_kernel(gx_ref, whh_ref, h0_ref, c0_ref, out_ref,
                   *, seq_len, batch, hidden):
    """Bidirectional single-layer LSTM recurrence (input projection pre-folded).

    gx_ref  : (T*B, 8H) per-step gate pre-activations from the token table:
              row block k*B:(k+1)*B holds, per-gate interleaved
              [i_f,i_r,f_f,f_r,g_f,g_r,o_f,o_r], the FORWARD tokens at t=k and the
              REVERSE tokens at t=T-1-k; biases added, g columns pre-scaled by 2.
    whh_ref : (2H, 8H) block-diagonal recurrent weights, same column order,
              g columns pre-scaled by 2.
    h0_ref  : (B, 2H)  [h0_forward | h0_reverse]
    c0_ref  : (B, 2H)  [c0_forward | c0_reverse]
    out_ref : (B, T*2H) batch-first flattened output; columns
              [t*2H : t*2H+H) = forward h_t, [t*2H+H : (t+1)*2H) = reverse h_t.
    """
    T, B, H = seq_len, batch, hidden

    whh = whh_ref[...]                          # (2H, 8H)
    h = h0_ref[...]                             # (B, 2H) = [h_f | h_r]
    c = c0_ref[...]                             # (B, 2H) = [c_f | c_r]

    # Fully-unrolled recurrence (T is static and small); only h/c live across steps.
    for k in range(T):
        gx = gx_ref[k * B:(k + 1) * B, :]       # (B, 8H) — one contiguous tile
        # Single MXU matmul on the serial path: (B, 2H) x (2H, 8H).
        gates = gx + jnp.dot(h, whh, preferred_element_type=jnp.float32)
        act = jax.nn.sigmoid(gates)             # ONE EUP chain over (B, 8H)
        i = act[:, 0:2 * H]                     # [i_f | i_r]
        f = act[:, 2 * H:4 * H]                 # [f_f | f_r]
        g = act[:, 4 * H:6 * H] * 2.0 - 1.0     # tanh(x) = 2*sigmoid(2x) - 1
        o = act[:, 6 * H:8 * H]                 # [o_f | o_r]
        c = f * c + i * g
        h = o * jnp.tanh(c)

        t_r = T - 1 - k
        out_ref[:, k * 2 * H:k * 2 * H + H] = h[:, 0:H]                 # fwd h_t, t=k
        out_ref[:, t_r * 2 * H + H:(t_r + 1) * 2 * H] = h[:, H:2 * H]   # rev h_t, t=T-1-k


def prepare_params(params):
    """One-time parameter preparation (not in the per-call path)."""
    H = params['whh_f'].shape[1]
    emb = params['embeddings']                                    # (V, E)

    # Fold embeddings + input weights + combined biases into per-token tables,
    # gate order (i, f, g, o); g columns pre-scaled by 2 (tanh-via-sigmoid trick).
    g_scale = jnp.concatenate([jnp.ones(2 * H, jnp.float32),
                               2.0 * jnp.ones(H, jnp.float32),
                               jnp.ones(H, jnp.float32)])[None, :]  # (1, 4H)

    def make_table(wih, bih, bhh):
        return (emb @ wih.T + (bih + bhh)[None, :]) * g_scale      # (V, 4H)

    table_f = make_table(params['wih_f'], params['bih_f'], params['bhh_f'])
    table_r = make_table(params['wih_r'], params['bih_r'], params['bhh_r'])

    # Block-diagonal recurrent weight (2H, 8H): per-gate interleaved columns
    # [i_f, i_r, f_f, f_r, g_f, g_r, o_f, o_r]; g columns pre-scaled by 2.
    zeros = jnp.zeros((H, H), jnp.float32)
    cols = []
    for gidx in range(4):
        s = 2.0 if gidx == 2 else 1.0
        wf = params['whh_f'][gidx * H:(gidx + 1) * H].T * s        # (H, H)
        wr = params['whh_r'][gidx * H:(gidx + 1) * H].T * s        # (H, H)
        cols.append(jnp.concatenate([wf, zeros], axis=0))          # forward block
        cols.append(jnp.concatenate([zeros, wr], axis=0))          # reverse block
    whh_blk = jnp.concatenate(cols, axis=1)                        # (2H, 8H)

    return dict(table_f=table_f, table_r=table_r, whh_blk=whh_blk)


@jax.jit
def abstract_encoder_forward(x_ids, prep, h0, c0):
    """AbstractEncoder.forward (eval mode).

    x_ids : (B, T) int32 token ids
    prep  : output of prepare_params()
    h0/c0 : (2, B, H) initial states (init_hidden's randn, made deterministic)
    returns (B, T, 2H) float32 — the LSTM `outputs` (batch_first)
    """
    B, T = x_ids.shape
    H = prep['whh_blk'].shape[0] // 2
    B_pad = ((B + 7) // 8) * 8                 # pad batch to the f32 sublane count (8)

    ids = jnp.transpose(x_ids)                 # (T, B): tiny int transpose only
    if B_pad != B:
        ids = jnp.pad(ids, ((0, 0), (0, B_pad - B)))
        h0 = jnp.pad(h0, ((0, 0), (0, B_pad - B), (0, 0)))
        c0 = jnp.pad(c0, ((0, 0), (0, B_pad - B), (0, 0)))

    # Embedding lookup + input projection + bias = one table gather per direction.
    # Reverse direction gathered time-reversed so the kernel reads contiguous tiles.
    ids_f = ids.reshape(-1)                                        # (T*B_pad,)
    ids_r = ids[::-1].reshape(-1)
    gx_f = jnp.take(prep['table_f'], ids_f, axis=0)                # (T*B_pad, 4H)
    gx_r = jnp.take(prep['table_r'], ids_r, axis=0)                # (T*B_pad, 4H)
    gx = jnp.stack([gx_f.reshape(T * B_pad, 4, H),
                    gx_r.reshape(T * B_pad, 4, H)],
                   axis=2).reshape(T * B_pad, 8 * H)               # per-gate interleave

    h0_cat = jnp.concatenate([h0[0], h0[1]], axis=1)               # (B_pad, 2H)
    c0_cat = jnp.concatenate([c0[0], c0[1]], axis=1)               # (B_pad, 2H)

    kernel = functools.partial(_bilstm_kernel, seq_len=T, batch=B_pad, hidden=H)
    vmem = pl.BlockSpec(memory_space=pltpu.MemorySpace.VMEM)
    out2d = pl.pallas_call(
        kernel,
        out_shape=jax.ShapeDtypeStruct((B_pad, T * 2 * H), jnp.float32),
        in_specs=[vmem] * 4,
        out_specs=vmem,
    )(gx, prep['whh_blk'], h0_cat, c0_cat)

    # Already batch-first: split the time axis back out and drop batch padding.
    return out2d.reshape(B_pad, T, 2 * H)[:B]


def reference_forward(x_ids, params, h0, c0):
    """Pure-JAX reference (mirrors torch.nn.LSTM bidirectional semantics)."""
    emb = jnp.take(params['embeddings'], x_ids, axis=0)        # (B, T, E)
    xs_tmajor = jnp.transpose(emb, (1, 0, 2))                  # (T, B, E)
    H = params['whh_f'].shape[1]

    def run_dir(wih, whh, b, h_init, c_init, reverse):
        xs = xs_tmajor[::-1] if reverse else xs_tmajor

        def step(carry, x_t):
            h, c = carry
            gates = x_t @ wih.T + h @ whh.T + b
            i = jax.nn.sigmoid(gates[:, :H])
            f = jax.nn.sigmoid(gates[:, H:2 * H])
            g = jnp.tanh(gates[:, 2 * H:3 * H])
            o = jax.nn.sigmoid(gates[:, 3 * H:4 * H])
            c = f * c + i * g
            h = o * jnp.tanh(c)
            return (h, c), h

        _, hs = lax.scan(step, (h_init, c_init), xs)
        if reverse:
            hs = hs[::-1]
        return jnp.transpose(hs, (1, 0, 2))                    # (B, T, H)

    b_f = params['bih_f'] + params['bhh_f']
    b_r = params['bih_r'] + params['bhh_r']
    out_f = run_dir(params['wih_f'], params['whh_f'], b_f, h0[0], c0[0], False)
    out_r = run_dir(params['wih_r'], params['whh_r'], b_r, h0[1], c0[1], True)
    return jnp.concatenate([out_f, out_r], axis=-1)


if __name__ == "__main__":
    VOCAB, EMB, HID = 16, 32, 32       # emb_dim=32, lstm_hdim=32
    B, T = 2, 8                        # sent_len = len(x) = B (as in the module)

    key = jax.random.PRNGKey(0)
    keys = jax.random.split(key, 12)
    scale = 1.0 / np.sqrt(HID)

    def u(k, shape):
        return jax.random.uniform(k, shape, jnp.float32, -scale, scale)

    params = dict(
        embeddings=jax.random.normal(keys[0], (VOCAB, EMB), jnp.float32),
        # forward direction (weight_ih_l0, weight_hh_l0, bias_ih_l0, bias_hh_l0)
        wih_f=u(keys[1], (4 * HID, EMB)),
        whh_f=u(keys[2], (4 * HID, HID)),
        bih_f=u(keys[3], (4 * HID,)),
        bhh_f=u(keys[4], (4 * HID,)),
        # reverse direction (*_reverse)
        wih_r=u(keys[5], (4 * HID, EMB)),
        whh_r=u(keys[6], (4 * HID, HID)),
        bih_r=u(keys[7], (4 * HID,)),
        bhh_r=u(keys[8], (4 * HID,)),
    )

    x = jax.random.randint(keys[9], (B, T), 0, VOCAB, jnp.int32)
    # init_hidden(sent_len): randn(2, sent_len, lstm_hdim) — made deterministic here.
    h0 = jax.random.normal(keys[10], (2, B, HID), jnp.float32)
    c0 = jax.random.normal(keys[11], (2, B, HID), jnp.float32)

    prep = prepare_params(params)
    out = abstract_encoder_forward(x, prep, h0, c0)
    out = jax.block_until_ready(out)
    assert out.shape == (B, T, 2 * HID), out.shape

    ref = reference_forward(x, params, h0, c0)
    np.testing.assert_allclose(np.asarray(out), np.asarray(ref), atol=1e-4, rtol=1e-4)

    print("KERNEL_OK")
</pallas_src>

<mosaic_0001>
module attributes {stable_mosaic.version = 11 : i64} {
  func.func @_bilstm_kernel(%arg0: memref<64x256xf32, #tpu.memory_space<vmem>>, %arg1: memref<64x256xf32, #tpu.memory_space<vmem>>, %arg2: memref<8x64xf32, #tpu.memory_space<vmem>>, %arg3: memref<8x64xf32, #tpu.memory_space<vmem>>, %arg4: memref<8x512xf32, #tpu.memory_space<vmem>>) attributes {dimension_semantics = [], scalar_prefetch = 0 : i64, scratch_operands = 0 : i64, tpu.core_type = #tpu.core_type<tc>} {
    %c0 = arith.constant 0 : index
    %c0_0 = arith.constant 0 : index
    %0 = vector.load %arg1[%c0, %c0_0] : memref<64x256xf32, #tpu.memory_space<vmem>>, vector<64x256xf32>
    %c0_1 = arith.constant 0 : index
    %c0_2 = arith.constant 0 : index
    %1 = vector.load %arg2[%c0_1, %c0_2] : memref<8x64xf32, #tpu.memory_space<vmem>>, vector<8x64xf32>
    %c0_3 = arith.constant 0 : index
    %c0_4 = arith.constant 0 : index
    %2 = vector.load %arg3[%c0_3, %c0_4] : memref<8x64xf32, #tpu.memory_space<vmem>>, vector<8x64xf32>
    %c0_5 = arith.constant 0 : index
    %c0_6 = arith.constant 0 : index
    %3 = vector.load %arg0[%c0_5, %c0_6] : memref<64x256xf32, #tpu.memory_space<vmem>>, vector<8x256xf32>
    %cst = arith.constant dense<0.000000e+00> : vector<8x256xf32>
    %4 = tpu.matmul %1, %0, %cst {dimension_numbers = #tpu.dot_dimension_numbers<[1], [0], [0], [1], [0, 0, 1, 1], [], []>} : vector<8x64xf32>, vector<64x256xf32>, vector<8x256xf32> -> vector<8x256xf32>
    %5 = arith.addf %3, %4 : vector<8x256xf32>
    %6 = arith.negf %5 : vector<8x256xf32>
    %7 = math.exp %6 : vector<8x256xf32>
    %cst_7 = arith.constant 1.000000e+00 : f32
    %8 = vector.broadcast %cst_7 : f32 to vector<8x256xf32>
    %9 = arith.addf %8, %7 : vector<8x256xf32>
    %10 = arith.divf %8, %9 : vector<8x256xf32>
    %11 = vector.extract_strided_slice %10 {offsets = [0, 0], sizes = [8, 64], strides = [1, 1]} : vector<8x256xf32> to vector<8x64xf32>
    %12 = vector.extract_strided_slice %10 {offsets = [0, 64], sizes = [8, 64], strides = [1, 1]} : vector<8x256xf32> to vector<8x64xf32>
    %13 = vector.extract_strided_slice %10 {offsets = [0, 128], sizes = [8, 64], strides = [1, 1]} : vector<8x256xf32> to vector<8x64xf32>
    %cst_8 = arith.constant 2.000000e+00 : f32
    %14 = vector.broadcast %cst_8 : f32 to vector<8x64xf32>
    %15 = arith.mulf %13, %14 : vector<8x64xf32>
    %cst_9 = arith.constant 1.000000e+00 : f32
    %16 = vector.broadcast %cst_9 : f32 to vector<8x64xf32>
    %17 = arith.subf %15, %16 : vector<8x64xf32>
    %18 = vector.extract_strided_slice %10 {offsets = [0, 192], sizes = [8, 64], strides = [1, 1]} : vector<8x256xf32> to vector<8x64xf32>
    %19 = arith.mulf %12, %2 : vector<8x64xf32>
    %20 = arith.mulf %11, %17 : vector<8x64xf32>
    %21 = arith.addf %19, %20 : vector<8x64xf32>
    %22 = math.tanh %21 : vector<8x64xf32>
    %23 = arith.mulf %18, %22 : vector<8x64xf32>
    %24 = vector.extract_strided_slice %23 {offsets = [0, 0], sizes = [8, 32], strides = [1, 1]} : vector<8x64xf32> to vector<8x32xf32>
    %c0_10 = arith.constant 0 : index
    %c0_11 = arith.constant 0 : index
    %25 = vector.load %arg4[%c0_10, %c0_11] : memref<8x512xf32, #tpu.memory_space<vmem>>, vector<8x32xf32>
    tpu.vector_store %arg4[%c0_10, %c0_11], %24 {strides = array<i32>} : memref<8x512xf32, #tpu.memory_space<vmem>>, vector<8x32xf32>,
    %26 = vector.extract_strided_slice %23 {offsets = [0, 32], sizes = [8, 32], strides = [1, 1]} : vector<8x64xf32> to vector<8x32xf32>
    %c0_12 = arith.constant 0 : index
    %c480 = arith.constant 480 : index
    %27 = vector.load %arg4[%c0_12, %c480] : memref<8x512xf32, #tpu.memory_space<vmem>>, vector<8x32xf32>
    tpu.vector_store %arg4[%c0_12, %c480], %26 {strides = array<i32>} : memref<8x512xf32, #tpu.memory_space<vmem>>, vector<8x32xf32>,
    %c8 = arith.constant 8 : index
    %c0_13 = arith.constant 0 : index
    %28 = vector.load %arg0[%c8, %c0_13] : memref<64x256xf32, #tpu.memory_space<vmem>>, vector<8x256xf32>
    %cst_14 = arith.constant dense<0.000000e+00> : vector<8x256xf32>
    %29 = tpu.matmul %23, %0, %cst_14 {dimension_numbers = #tpu.dot_dimension_numbers<[1], [0], [0], [1], [0, 0, 1, 1], [], []>} : vector<8x64xf32>, vector<64x256xf32>, vector<8x256xf32> -> vector<8x256xf32>
    %30 = arith.addf %28, %29 : vector<8x256xf32>
    %31 = arith.negf %30 : vector<8x256xf32>
    %32 = math.exp %31 : vector<8x256xf32>
    %cst_15 = arith.constant 1.000000e+00 : f32
    %33 = vector.broadcast %cst_15 : f32 to vector<8x256xf32>
    %34 = arith.addf %33, %32 : vector<8x256xf32>
    %35 = arith.divf %33, %34 : vector<8x256xf32>
    %36 = vector.extract_strided_slice %35 {offsets = [0, 0], sizes = [8, 64], strides = [1, 1]} : vector<8x256xf32> to vector<8x64xf32>
    %37 = vector.extract_strided_slice %35 {offsets = [0, 64], sizes = [8, 64], strides = [1, 1]} : vector<8x256xf32> to vector<8x64xf32>
    %38 = vector.extract_strided_slice %35 {offsets = [0, 128], sizes = [8, 64], strides = [1, 1]} : vector<8x256xf32> to vector<8x64xf32>
    %cst_16 = arith.constant 2.000000e+00 : f32
    %39 = vector.broadcast %cst_16 : f32 to vector<8x64xf32>
    %40 = arith.mulf %38, %39 : vector<8x64xf32>
    %cst_17 = arith.constant 1.000000e+00 : f32
    %41 = vector.broadcast %cst_17 : f32 to vector<8x64xf32>
    %42 = arith.subf %40, %41 : vector<8x64xf32>
    %43 = vector.extract_strided_slice %35 {offsets = [0, 192], sizes = [8, 64], strides = [1, 1]} : vector<8x256xf32> to vector<8x64xf32>
    %44 = arith.mulf %37, %21 : vector<8x64xf32>
    %45 = arith.mulf %36, %42 : vector<8x64xf32>
    %46 = arith.addf %44, %45 : vector<8x64xf32>
    %47 = math.tanh %46 : vector<8x64xf32>
    %48 = arith.mulf %43, %47 : vector<8x64xf32>
    %49 = vector.extract_strided_slice %48 {offsets = [0, 0], sizes = [8, 32], strides = [1, 1]} : vector<8x64xf32> to vector<8x32xf32>
    %c0_18 = arith.constant 0 : index
    %c64 = arith.constant 64 : index
    %50 = vector.load %arg4[%c0_18, %c64] : memref<8x512xf32, #tpu.memory_space<vmem>>, vector<8x32xf32>
    tpu.vector_store %arg4[%c0_18, %c64], %49 {strides = array<i32>} : memref<8x512xf32, #tpu.memory_space<vmem>>, vector<8x32xf32>,
    %51 = vector.extract_strided_slice %48 {offsets = [0, 32], sizes = [8, 32], strides = [1, 1]} : vector<8x64xf32> to vector<8x32xf32>
    %c0_19 = arith.constant 0 : index
    %c416 = arith.constant 416 : index
    %52 = vector.load %arg4[%c0_19, %c416] : memref<8x512xf32, #tpu.memory_space<vmem>>, vector<8x32xf32>
    tpu.vector_store %arg4[%c0_19, %c416], %51 {strides = array<i32>} : memref<8x512xf32, #tpu.memory_space<vmem>>, vector<8x32xf32>,
    %c16 = arith.constant 16 : index
    %c0_20 = arith.constant 0 : index
    %53 = vector.load %arg0[%c16, %c0_20] : memref<64x256xf32, #tpu.memory_space<vmem>>, vector<8x256xf32>
    %cst_21 = arith.constant dense<0.000000e+00> : vector<8x256xf32>
    %54 = tpu.matmul %48, %0, %cst_21 {dimension_numbers = #tpu.dot_dimension_numbers<[1], [0], [0], [1], [0, 0, 1, 1], [], []>} : vector<8x64xf32>, vector<64x256xf32>, vector<8x256xf32> -> vector<8x256xf32>
    %55 = arith.addf %53, %54 : vector<8x256xf32>
    %56 = arith.negf %55 : vector<8x256xf32>
    %57 = math.exp %56 : vector<8x256xf32>
    %cst_22 = arith.constant 1.000000e+00 : f32
    %58 = vector.broadcast %cst_22 : f32 to vector<8x256xf32>
    %59 = arith.addf %58, %57 : vector<8x256xf32>
    %60 = arith.divf %58, %59 : vector<8x256xf32>
    %61 = vector.extract_strided_slice %60 {offsets = [0, 0], sizes = [8, 64], strides = [1, 1]} : vector<8x256xf32> to vector<8x64xf32>
    %62 = vector.extract_strided_slice %60 {offsets = [0, 64], sizes = [8, 64], strides = [1, 1]} : vector<8x256xf32> to vector<8x64xf32>
    %63 = vector.extract_strided_slice %60 {offsets = [0, 128], sizes = [8, 64], strides = [1, 1]} : vector<8x256xf32> to vector<8x64xf32>
    %cst_23 = arith.constant 2.000000e+00 : f32
    %64 = vector.broadcast %cst_23 : f32 to vector<8x64xf32>
    %65 = arith.mulf %63, %64 : vector<8x64xf32>
    %cst_24 = arith.constant 1.000000e+00 : f32
    %66 = vector.broadcast %cst_24 : f32 to vector<8x64xf32>
    %67 = arith.subf %65, %66 : vector<8x64xf32>
    %68 = vector.extract_strided_slice %60 {offsets = [0, 192], sizes = [8, 64], strides = [1, 1]} : vector<8x256xf32> to vector<8x64xf32>
    %69 = arith.mulf %62, %46 : vector<8x64xf32>
    %70 = arith.mulf %61, %67 : vector<8x64xf32>
    %71 = arith.addf %69, %70 : vector<8x64xf32>
    %72 = math.tanh %71 : vector<8x64xf32>
    %73 = arith.mulf %68, %72 : vector<8x64xf32>
    %74 = vector.extract_strided_slice %73 {offsets = [0, 0], sizes = [8, 32], strides = [1, 1]} : vector<8x64xf32> to vector<8x32xf32>
    %c0_25 = arith.constant 0 : index
    %c128 = arith.constant 128 : index
    %75 = vector.load %arg4[%c0_25, %c128] : memref<8x512xf32, #tpu.memory_space<vmem>>, vector<8x32xf32>
    tpu.vector_store %arg4[%c0_25, %c128], %74 {strides = array<i32>} : memref<8x512xf32, #tpu.memory_space<vmem>>, vector<8x32xf32>,
    %76 = vector.extract_strided_slice %73 {offsets = [0, 32], sizes = [8, 32], strides = [1, 1]} : vector<8x64xf32> to vector<8x32xf32>
    %c0_26 = arith.constant 0 : index
    %c352 = arith.constant 352 : index
    %77 = vector.load %arg4[%c0_26, %c352] : memref<8x512xf32, #tpu.memory_space<vmem>>, vector<8x32xf32>
    tpu.vector_store %arg4[%c0_26, %c352], %76 {strides = array<i32>} : memref<8x512xf32, #tpu.memory_space<vmem>>, vector<8x32xf32>,
    %c24 = arith.constant 24 : index
    %c0_27 = arith.constant 0 : index
    %78 = vector.load %arg0[%c24, %c0_27] : memref<64x256xf32, #tpu.memory_space<vmem>>, vector<8x256xf32>
    %cst_28 = arith.constant dense<0.000000e+00> : vector<8x256xf32>
    %79 = tpu.matmul %73, %0, %cst_28 {dimension_numbers = #tpu.dot_dimension_numbers<[1], [0], [0], [1], [0, 0, 1, 1], [], []>} : vector<8x64xf32>, vector<64x256xf32>, vector<8x256xf32> -> vector<8x256xf32>
    %80 = arith.addf %78, %79 : vector<8x256xf32>
    %81 = arith.negf %80 : vector<8x256xf32>
    %82 = math.exp %81 : vector<8x256xf32>
    %cst_29 = arith.constant 1.000000e+00 : f32
    %83 = vector.broadcast %cst_29 : f32 to vector<8x256xf32>
    %84 = arith.addf %83, %82 : vector<8x256xf32>
    %85 = arith.divf %83, %84 : vector<8x256xf32>
    %86 = vector.extract_strided_slice %85 {offsets = [0, 0], sizes = [8, 64], strides = [1, 1]} : vector<8x256xf32> to vector<8x64xf32>
    %87 = vector.extract_strided_slice %85 {offsets = [0, 64], sizes = [8, 64], strides = [1, 1]} : vector<8x256xf32> to vector<8x64xf32>
    %88 = vector.extract_strided_slice %85 {offsets = [0, 128], sizes = [8, 64], strides = [1, 1]} : vector<8x256xf32> to vector<8x64xf32>
    %cst_30 = arith.constant 2.000000e+00 : f32
    %89 = vector.broadcast %cst_30 : f32 to vector<8x64xf32>
    %90 = arith.mulf %88, %89 : vector<8x64xf32>
    %cst_31 = arith.constant 1.000000e+00 : f32
    %91 = vector.broadcast %cst_31 : f32 to vector<8x64xf32>
    %92 = arith.subf %90, %91 : vector<8x64xf32>
    %93 = vector.extract_strided_slice %85 {offsets = [0, 192], sizes = [8, 64], strides = [1, 1]} : vector<8x256xf32> to vector<8x64xf32>
    %94 = arith.mulf %87, %71 : vector<8x64xf32>
    %95 = arith.mulf %86, %92 : vector<8x64xf32>
    %96 = arith.addf %94, %95 : vector<8x64xf32>
    %97 = math.tanh %96 : vector<8x64xf32>
    %98 = arith.mulf %93, %97 : vector<8x64xf32>
    %99 = vector.extract_strided_slice %98 {offsets = [0, 0], sizes = [8, 32], strides = [1, 1]} : vector<8x64xf32> to vector<8x32xf32>
    %c0_32 = arith.constant 0 : index
    %c192 = arith.constant 192 : index
    %100 = vector.load %arg4[%c0_32, %c192] : memref<8x512xf32, #tpu.memory_space<vmem>>, vector<8x32xf32>
    tpu.vector_store %arg4[%c0_32, %c192], %99 {strides = array<i32>} : memref<8x512xf32, #tpu.memory_space<vmem>>, vector<8x32xf32>,
    %101 = vector.extract_strided_slice %98 {offsets = [0, 32], sizes = [8, 32], strides = [1, 1]} : vector<8x64xf32> to vector<8x32xf32>
    %c0_33 = arith.constant 0 : index
    %c288 = arith.constant 288 : index
    %102 = vector.load %arg4[%c0_33, %c288] : memref<8x512xf32, #tpu.memory_space<vmem>>, vector<8x32xf32>
    tpu.vector_store %arg4[%c0_33, %c288], %101 {strides = array<i32>} : memref<8x512xf32, #tpu.memory_space<vmem>>, vector<8x32xf32>,
    %c32 = arith.constant 32 : index
    %c0_34 = arith.constant 0 : index
    %103 = vector.load %arg0[%c32, %c0_34] : memref<64x256xf32, #tpu.memory_space<vmem>>, vector<8x256xf32>
    %cst_35 = arith.constant dense<0.000000e+00> : vector<8x256xf32>
    %104 = tpu.matmul %98, %0, %cst_35 {dimension_numbers = #tpu.dot_dimension_numbers<[1], [0], [0], [1], [0, 0, 1, 1], [], []>} : vector<8x64xf32>, vector<64x256xf32>, vector<8x256xf32> -> vector<8x256xf32>
    %105 = arith.addf %103, %104 : vector<8x256xf32>
    %106 = arith.negf %105 : vector<8x256xf32>
    %107 = math.exp %106 : vector<8x256xf32>
    %cst_36 = arith.constant 1.000000e+00 : f32
    %108 = vector.broadcast %cst_36 : f32 to vector<8x256xf32>
    %109 = arith.addf %108, %107 : vector<8x256xf32>
    %110 = arith.divf %108, %109 : vector<8x256xf32>
    %111 = vector.extract_strided_slice %110 {offsets = [0, 0], sizes = [8, 64], strides = [1, 1]} : vector<8x256xf32> to vector<8x64xf32>
    %112 = vector.extract_strided_slice %110 {offsets = [0, 64], sizes = [8, 64], strides = [1, 1]} : vector<8x256xf32> to vector<8x64xf32>
    %113 = vector.extract_strided_slice %110 {offsets = [0, 128], sizes = [8, 64], strides = [1, 1]} : vector<8x256xf32> to vector<8x64xf32>
    %cst_37 = arith.constant 2.000000e+00 : f32
    %114 = vector.broadcast %cst_37 : f32 to vector<8x64xf32>
    %115 = arith.mulf %113, %114 : vector<8x64xf32>
    %cst_38 = arith.constant 1.000000e+00 : f32
    %116 = vector.broadcast %cst_38 : f32 to vector<8x64xf32>
    %117 = arith.subf %115, %116 : vector<8x64xf32>
    %118 = vector.extract_strided_slice %110 {offsets = [0, 192], sizes = [8, 64], strides = [1, 1]} : vector<8x256xf32> to vector<8x64xf32>
    %119 = arith.mulf %112, %96 : vector<8x64xf32>
    %120 = arith.mulf %111, %117 : vector<8x64xf32>
    %121 = arith.addf %119, %120 : vector<8x64xf32>
    %122 = math.tanh %121 : vector<8x64xf32>
    %123 = arith.mulf %118, %122 : vector<8x64xf32>
    %124 = vector.extract_strided_slice %123 {offsets = [0, 0], sizes = [8, 32], strides = [1, 1]} : vector<8x64xf32> to vector<8x32xf32>
    %c0_39 = arith.constant 0 : index
    %c256 = arith.constant 256 : index
    %125 = vector.load %arg4[%c0_39, %c256] : memref<8x512xf32, #tpu.memory_space<vmem>>, vector<8x32xf32>
    tpu.vector_store %arg4[%c0_39, %c256], %124 {strides = array<i32>} : memref<8x512xf32, #tpu.memory_space<vmem>>, vector<8x32xf32>,
    %126 = vector.extract_strided_slice %123 {offsets = [0, 32], sizes = [8, 32], strides = [1, 1]} : vector<8x64xf32> to vector<8x32xf32>
    %c0_40 = arith.constant 0 : index
    %c224 = arith.constant 224 : index
    %127 = vector.load %arg4[%c0_40, %c224] : memref<8x512xf32, #tpu.memory_space<vmem>>, vector<8x32xf32>
    tpu.vector_store %arg4[%c0_40, %c224], %126 {strides = array<i32>} : memref<8x512xf32, #tpu.memory_space<vmem>>, vector<8x32xf32>,
    %c40 = arith.constant 40 : index
    %c0_41 = arith.constant 0 : index
    %128 = vector.load %arg0[%c40, %c0_41] : memref<64x256xf32, #tpu.memory_space<vmem>>, vector<8x256xf32>
    %cst_42 = arith.constant dense<0.000000e+00> : vector<8x256xf32>
    %129 = tpu.matmul %123, %0, %cst_42 {dimension_numbers = #tpu.dot_dimension_numbers<[1], [0], [0], [1], [0, 0, 1, 1], [], []>} : vector<8x64xf32>, vector<64x256xf32>, vector<8x256xf32> -> vector<8x256xf32>
    %130 = arith.addf %128, %129 : vector<8x256xf32>
    %131 = arith.negf %130 : vector<8x256xf32>
    %132 = math.exp %131 : vector<8x256xf32>
    %cst_43 = arith.constant 1.000000e+00 : f32
    %133 = vector.broadcast %cst_43 : f32 to vector<8x256xf32>
    %134 = arith.addf %133, %132 : vector<8x256xf32>
    %135 = arith.divf %133, %134 : vector<8x256xf32>
    %136 = vector.extract_strided_slice %135 {offsets = [0, 0], sizes = [8, 64], strides = [1, 1]} : vector<8x256xf32> to vector<8x64xf32>
    %137 = vector.extract_strided_slice %135 {offsets = [0, 64], sizes = [8, 64], strides = [1, 1]} : vector<8x256xf32> to vector<8x64xf32>
    %138 = vector.extract_strided_slice %135 {offsets = [0, 128], sizes = [8, 64], strides = [1, 1]} : vector<8x256xf32> to vector<8x64xf32>
    %cst_44 = arith.constant 2.000000e+00 : f32
    %139 = vector.broadcast %cst_44 : f32 to vector<8x64xf32>
    %140 = arith.mulf %138, %139 : vector<8x64xf32>
    %cst_45 = arith.constant 1.000000e+00 : f32
    %141 = vector.broadcast %cst_45 : f32 to vector<8x64xf32>
    %142 = arith.subf %140, %141 : vector<8x64xf32>
    %143 = vector.extract_strided_slice %135 {offsets = [0, 192], sizes = [8, 64], strides = [1, 1]} : vector<8x256xf32> to vector<8x64xf32>
    %144 = arith.mulf %137, %121 : vector<8x64xf32>
    %145 = arith.mulf %136, %142 : vector<8x64xf32>
    %146 = arith.addf %144, %145 : vector<8x64xf32>
    %147 = math.tanh %146 : vector<8x64xf32>
    %148 = arith.mulf %143, %147 : vector<8x64xf32>
    %149 = vector.extract_strided_slice %148 {offsets = [0, 0], sizes = [8, 32], strides = [1, 1]} : vector<8x64xf32> to vector<8x32xf32>
    %c0_46 = arith.constant 0 : index
    %c320 = arith.constant 320 : index
    %150 = vector.load %arg4[%c0_46, %c320] : memref<8x512xf32, #tpu.memory_space<vmem>>, vector<8x32xf32>
    tpu.vector_store %arg4[%c0_46, %c320], %149 {strides = array<i32>} : memref<8x512xf32, #tpu.memory_space<vmem>>, vector<8x32xf32>,
    %151 = vector.extract_strided_slice %148 {offsets = [0, 32], sizes = [8, 32], strides = [1, 1]} : vector<8x64xf32> to vector<8x32xf32>
    %c0_47 = arith.constant 0 : index
    %c160 = arith.constant 160 : index
    %152 = vector.load %arg4[%c0_47, %c160] : memref<8x512xf32, #tpu.memory_space<vmem>>, vector<8x32xf32>
    tpu.vector_store %arg4[%c0_47, %c160], %151 {strides = array<i32>} : memref<8x512xf32, #tpu.memory_space<vmem>>, vector<8x32xf32>,
    %c48 = arith.constant 48 : index
    %c0_48 = arith.constant 0 : index
    %153 = vector.load %arg0[%c48, %c0_48] : memref<64x256xf32, #tpu.memory_space<vmem>>, vector<8x256xf32>
    %cst_49 = arith.constant dense<0.000000e+00> : vector<8x256xf32>
    %154 = tpu.matmul %148, %0, %cst_49 {dimension_numbers = #tpu.dot_dimension_numbers<[1], [0], [0], [1], [0, 0, 1, 1], [], []>} : vector<8x64xf32>, vector<64x256xf32>, vector<8x256xf32> -> vector<8x256xf32>
    %155 = arith.addf %153, %154 : vector<8x256xf32>
    %156 = arith.negf %155 : vector<8x256xf32>
    %157 = math.exp %156 : vector<8x256xf32>
    %cst_50 = arith.constant 1.000000e+00 : f32
    %158 = vector.broadcast %cst_50 : f32 to vector<8x256xf32>
    %159 = arith.addf %158, %157 : vector<8x256xf32>
    %160 = arith.divf %158, %159 : vector<8x256xf32>
    %161 = vector.extract_strided_slice %160 {offsets = [0, 0], sizes = [8, 64], strides = [1, 1]} : vector<8x256xf32> to vector<8x64xf32>
    %162 = vector.extract_strided_slice %160 {offsets = [0, 64], sizes = [8, 64], strides = [1, 1]} : vector<8x256xf32> to vector<8x64xf32>
    %163 = vector.extract_strided_slice %160 {offsets = [0, 128], sizes = [8, 64], strides = [1, 1]} : vector<8x256xf32> to vector<8x64xf32>
    %cst_51 = arith.constant 2.000000e+00 : f32
    %164 = vector.broadcast %cst_51 : f32 to vector<8x64xf32>
    %165 = arith.mulf %163, %164 : vector<8x64xf32>
    %cst_52 = arith.constant 1.000000e+00 : f32
    %166 = vector.broadcast %cst_52 : f32 to vector<8x64xf32>
    %167 = arith.subf %165, %166 : vector<8x64xf32>
    %168 = vector.extract_strided_slice %160 {offsets = [0, 192], sizes = [8, 64], strides = [1, 1]} : vector<8x256xf32> to vector<8x64xf32>
    %169 = arith.mulf %162, %146 : vector<8x64xf32>
    %170 = arith.mulf %161, %167 : vector<8x64xf32>
    %171 = arith.addf %169, %170 : vector<8x64xf32>
    %172 = math.tanh %171 : vector<8x64xf32>
    %173 = arith.mulf %168, %172 : vector<8x64xf32>
    %174 = vector.extract_strided_slice %173 {offsets = [0, 0], sizes = [8, 32], strides = [1, 1]} : vector<8x64xf32> to vector<8x32xf32>
    %c0_53 = arith.constant 0 : index
    %c384 = arith.constant 384 : index
    %175 = vector.load %arg4[%c0_53, %c384] : memref<8x512xf32, #tpu.memory_space<vmem>>, vector<8x32xf32>
    tpu.vector_store %arg4[%c0_53, %c384], %174 {strides = array<i32>} : memref<8x512xf32, #tpu.memory_space<vmem>>, vector<8x32xf32>,
    %176 = vector.extract_strided_slice %173 {offsets = [0, 32], sizes = [8, 32], strides = [1, 1]} : vector<8x64xf32> to vector<8x32xf32>
    %c0_54 = arith.constant 0 : index
    %c96 = arith.constant 96 : index
    %177 = vector.load %arg4[%c0_54, %c96] : memref<8x512xf32, #tpu.memory_space<vmem>>, vector<8x32xf32>
    tpu.vector_store %arg4[%c0_54, %c96], %176 {strides = array<i32>} : memref<8x512xf32, #tpu.memory_space<vmem>>, vector<8x32xf32>,
    %c56 = arith.constant 56 : index
    %c0_55 = arith.constant 0 : index
    %178 = vector.load %arg0[%c56, %c0_55] : memref<64x256xf32, #tpu.memory_space<vmem>>, vector<8x256xf32>
    %cst_56 = arith.constant dense<0.000000e+00> : vector<8x256xf32>
    %179 = tpu.matmul %173, %0, %cst_56 {dimension_numbers = #tpu.dot_dimension_numbers<[1], [0], [0], [1], [0, 0, 1, 1], [], []>} : vector<8x64xf32>, vector<64x256xf32>, vector<8x256xf32> -> vector<8x256xf32>
    %180 = arith.addf %178, %179 : vector<8x256xf32>
    %181 = arith.negf %180 : vector<8x256xf32>
    %182 = math.exp %181 : vector<8x256xf32>
    %cst_57 = arith.constant 1.000000e+00 : f32
    %183 = vector.broadcast %cst_57 : f32 to vector<8x256xf32>
    %184 = arith.addf %183, %182 : vector<8x256xf32>
    %185 = arith.divf %183, %184 : vector<8x256xf32>
    %186 = vector.extract_strided_slice %185 {offsets = [0, 0], sizes = [8, 64], strides = [1, 1]} : vector<8x256xf32> to vector<8x64xf32>
    %187 = vector.extract_strided_slice %185 {offsets = [0, 64], sizes = [8, 64], strides = [1, 1]} : vector<8x256xf32> to vector<8x64xf32>
    %188 = vector.extract_strided_slice %185 {offsets = [0, 128], sizes = [8, 64], strides = [1, 1]} : vector<8x256xf32> to vector<8x64xf32>
    %cst_58 = arith.constant 2.000000e+00 : f32
    %189 = vector.broadcast %cst_58 : f32 to vector<8x64xf32>
    %190 = arith.mulf %188, %189 : vector<8x64xf32>
    %cst_59 = arith.constant 1.000000e+00 : f32
    %191 = vector.broadcast %cst_59 : f32 to vector<8x64xf32>
    %192 = arith.subf %190, %191 : vector<8x64xf32>
    %193 = vector.extract_strided_slice %185 {offsets = [0, 192], sizes = [8, 64], strides = [1, 1]} : vector<8x256xf32> to vector<8x64xf32>
    %194 = arith.mulf %187, %171 : vector<8x64xf32>
    %195 = arith.mulf %186, %192 : vector<8x64xf32>
    %196 = arith.addf %194, %195 : vector<8x64xf32>
    %197 = math.tanh %196 : vector<8x64xf32>
    %198 = arith.mulf %193, %197 : vector<8x64xf32>
    %199 = vector.extract_strided_slice %198 {offsets = [0, 0], sizes = [8, 32], strides = [1, 1]} : vector<8x64xf32> to vector<8x32xf32>
    %c0_60 = arith.constant 0 : index
    %c448 = arith.constant 448 : index
    %200 = vector.load %arg4[%c0_60, %c448] : memref<8x512xf32, #tpu.memory_space<vmem>>, vector<8x32xf32>
    tpu.vector_store %arg4[%c0_60, %c448], %199 {strides = array<i32>} : memref<8x512xf32, #tpu.memory_space<vmem>>, vector<8x32xf32>,
    %201 = vector.extract_strided_slice %198 {offsets = [0, 32], sizes = [8, 32], strides = [1, 1]} : vector<8x64xf32> to vector<8x32xf32>
    %c0_61 = arith.constant 0 : index
    %c32_62 = arith.constant 32 : index
    %202 = vector.load %arg4[%c0_61, %c32_62] : memref<8x512xf32, #tpu.memory_space<vmem>>, vector<8x32xf32>
    tpu.vector_store %arg4[%c0_61, %c32_62], %201 {strides = array<i32>} : memref<8x512xf32, #tpu.memory_space<vmem>>, vector<8x32xf32>,
    return
  }
}

</mosaic_0001>

<bundles_post_ra>
// kernel: abstract_encoder_forward.1
= control target key start
LH: loop header
LB: loop body
LE: loop exit
PB: predicated region body
PF: predicated region fallthrough
CT: control target
= control target key end

     0   :  { %v1011_v3 = vmov 0.0   ;;  %s1012_s9 = smov 64   ;;  %vm37_vm0 = vcmask 523264   ;;  %vm147_vm1 = vcmask 1048320   ;;  %vm145_vm2 = vcmask 261120   ;;  %s1397_s1 = inlined_call_operand.vmem [shape: f32[64,256], index: 1, kind: input, shape index: {}]   ;;  %s1398_s3 = inlined_call_operand.vmem [shape: f32[8,64], index: 3, kind: input, shape index: {}]   ;;  %s1399_s2 = inlined_call_operand.vmem [shape: f32[8,64], index: 2, kind: input, shape index: {}]   ;;  %s1400_s0 = inlined_call_operand.vmem [shape: f32[64,256], index: 0, kind: input, shape index: {}]   ;;  %s1401_s4 = inlined_call_operand.vmem [shape: f32[8,512], index: 4, kind: output, shape index: {}]  }
   0x1   :  { %v1041_v0 = vld [vmem:[%s1397_s1 + $0x78] sm:$0xff]  ;;  %v1046_v1 = vld [vmem:[%s1397_s1 + $0x70] sm:$0xff]  ;;  %v1051_v2 = vld [vmem:[%s1397_s1 + $0x68] sm:$0xff]  ;;  %105 = vmatprep.mubr.f32.mxu0 %v1011_v3  ;;  %217 = vmatprep.mubr.f32.mxu1 %v1011_v3  ;;  %vm249_vm3 = vcmask 785920   ;;  %vm255_vm4 = vcmask 523520  }
   0x2   :  { %57 = vmatprep.subr.mxu0 %v1041_v0  ;;  %v1059_v4 = vld [vmem:[%s1397_s1 + $0x60] sm:$0xff]  ;;  %169 = vmatprep.subr.mxu1 %v1041_v0  ;;  %v1066_v5 = vld [vmem:[%s1397_s1 + $0x58] sm:$0xff]  ;;  %v1073_v6 = vld [vmem:[%s1397_s1 + $0x50] sm:$0xff] }
   0x3   :  { %58 = vmatpush1.msra.mxu0 %v1046_v1  ;;  %170 = vmatpush1.msra.mxu1 %v1046_v1  ;;  %v1080_v7 = vld [vmem:[%s1397_s1 + $0x48] sm:$0xff]  ;;  %v1087_v8 = vld [vmem:[%s1397_s1 + $0x40] sm:$0xff]  ;;  %v1097_v10 = vld [vmem:[%s1397_s1 + $0x38] sm:$0xff] }
   0x4   :  { %59 = vmatprep.subr.mxu0 %v1051_v2  ;;  %171 = vmatprep.subr.mxu1 %v1051_v2  ;;  %v34_v9 = vld [vmem:[%s1398_s3] sm:$0xff]  ;;  %v1104_v11 = vld [vmem:[%s1397_s1 + $0x30] sm:$0xff]  ;;  %v1111_v12 = vld [vmem:[%s1397_s1 + $0x28] sm:$0xff] }
   0x5   :  { %60 = vmatpush1.msra.mxu0 %v1059_v4  ;;  %172 = vmatpush1.msra.mxu1 %v1059_v4  ;;  %v1118_v13 = vld [vmem:[%s1397_s1 + $0x20] sm:$0xff]  ;;  %v1125_v14 = vld [vmem:[%s1397_s1 + $0x18] sm:$0xff]  ;;  %v1132_v15 = vld [vmem:[%s1397_s1 + $0x10] sm:$0xff] }
   0x6   :  { %61 = vmatprep.subr.mxu0 %v1066_v5  ;;  %173 = vmatprep.subr.mxu1 %v1066_v5  ;;  %v1139_v16 = vld [vmem:[%s1397_s1 + $0x8] sm:$0xff]  ;;  %v1146_v17 = vld [vmem:[%s1397_s1] sm:$0xff]  ;;  %v149_v43 = vld [vmem:[%s1400_s0 + $0x10] sm:$0xff] }
   0x7   :  { %62 = vmatpush1.msra.mxu0 %v1073_v6  ;;  %129 = vrot.lane.b32.xlu0 %v34_v9, %s1012_s9  ;;  %v33_v18 = vld [vmem:[%s1399_s2] sm:$0xff]  ;;  %v36_v21 = vld [vmem:[%s1400_s0 + $0x8] sm:$0xff]  ;;  %v150_v45 = vld [vmem:[%s1400_s0 + $0x18] sm:$0xff] }
   0x8   :  { %63 = vmatprep.subr.mxu0 %v1080_v7  ;;  %174 = vmatpush1.msra.mxu1 %v1073_v6  ;;  %v35_v19 = vld [vmem:[%s1400_s0] sm:$0xff] }
   0x9   :  { %64 = vmatpush1.msra.mxu0 %v1087_v8  ;;  %175 = vmatprep.subr.mxu1 %v1080_v7 }
   0xa   :  { %65 = vmatprep.subr.mxu0 %v1097_v10  ;;  %176 = vmatpush1.msra.mxu1 %v1087_v8 }
   0xb   :  { %66 = vmatpush1.msra.mxu0 %v1104_v11  ;;  %177 = vmatprep.subr.mxu1 %v1097_v10 }
   0xc   :  { %67 = vmatprep.subr.mxu0 %v1111_v12  ;;  %178 = vmatpush1.msra.mxu1 %v1104_v11 }
   0xd   :  { %68 = vmatpush1.msra.mxu0 %v1118_v13  ;;  %179 = vmatprep.subr.mxu1 %v1111_v12 }
   0xe   :  { %69 = vmatprep.subr.mxu0 %v1125_v14  ;;  %180 = vmatpush1.msra.mxu1 %v1118_v13 }
   0xf   :  { %70 = vmatpush1.msra.mxu0 %v1132_v15  ;;  %181 = vmatprep.subr.mxu1 %v1125_v14 }
  0x10   :  { %71 = vmatprep.subr.mxu0 %v1139_v16  ;;  %182 = vmatpush1.msra.mxu1 %v1132_v15 }
  0x11   :  { %72 = vmatpush1.msra.mxu0 %v1146_v17  ;;  %183 = vmatprep.subr.mxu1 %v1139_v16 }
  0x12   :  { %897 = vmatmul.mubr.msk.f32.vlgmr.msra.gmra.mxu0 %vm37_vm0, %v33_v18  ;;  %184 = vmatpush1.msra.mxu1 %v1146_v17 }
  0x13   :  { %277 = vmatprep.subr.mxu0 %v1041_v0  ;;  %325 = vmatprep.mubr.f32.mxu0 %v1011_v3 }
  0x14   :  { %278 = vmatpush1.msra.mxu0 %v1046_v1  ;;  %383 = vmatprep.subr.mxu1 %v1041_v0 }
  0x15   :  { %279 = vmatprep.subr.mxu0 %v1051_v2 }
  0x16   :  { %280 = vmatpush1.msra.mxu0 %v1059_v4 }
  0x17   :  { %281 = vmatprep.subr.mxu0 %v1066_v5 }
  0x18   :  { %282 = vmatpush1.msra.mxu0 %v1073_v6 }
  0x19   :  { %283 = vmatprep.subr.mxu0 %v1080_v7 }
  0x1a   :  { %284 = vmatpush1.msra.mxu0 %v1087_v8 }
  0x1b   :  { %285 = vmatprep.subr.mxu0 %v1097_v10 }
  0x1c   :  { %286 = vmatpush1.msra.mxu0 %v1104_v11 }
  0x1d   :  { %287 = vmatprep.subr.mxu0 %v1111_v12 }
  0x1e   :  { %288 = vmatpush1.msra.mxu0 %v1118_v13 }
  0x1f   :  { %289 = vmatprep.subr.mxu0 %v1125_v14 }
  0x20   :  { %290 = vmatpush1.msra.mxu0 %v1132_v15 }
  0x21   :  { %291 = vmatprep.subr.mxu0 %v1139_v16 }
  0x22   :  { %292 = vmatpush1.msra.mxu0 %v1146_v17 }
  0x23   :  { %489 = vmatprep.subr.mxu0 %v1041_v0 }
  0x79   :  { %v130_v36 = vpop.permute.xlu0 %129 }
  0xd2   :  { %v107_v20 = vpop.f32.mrf.mxu0 }
  0xd3   :  { %v112_v22 = vadd.f32 %v107_v20, %v35_v19  ;;  %v257_v19 = vld [vmem:[%s1400_s0 + $0x20] sm:$0xff] }
  0xd4   :  { %v109_v23 = vpop.f32.mrf.mxu0 }
  0xd5   :  { %v898_v24 = vmul.f32 -1.442695, %v112_v22  ;;  %v113_v25 = vadd.f32 %v109_v23, %v36_v21  ;;  %v258_v21 = vld [vmem:[%s1400_s0 + $0x28] sm:$0xff] }
  0xd7   :  { %v899_v26 = vmul.f32 -1.442695, %v113_v25  ;;  %931 = vpow2.f32 %v898_v24 }
  0xd9   :  { %933 = vpow2.f32 %v899_v26 }
  0xe4   :  { %v932_v27 = vpop.eup %931 }
  0xe5   :  { %v120_v30 = vadd.f32 1.0, %v932_v27 }
  0xe6   :  { %v934_v28 = vpop.eup %933 }
  0xe7   :  { %v121_v29 = vadd.f32 1.0, %v934_v28 }
  0xe9   :  { %935 = vrcp.f32 %v121_v29 }
  0xea   :  { %937 = vrcp.f32 %v120_v30 }
  0xf6   :  { %v936_v31 = vpop.eup %935 }
  0xf7   :  { %v126_v32 = vmul.f32 2.0, %v936_v31  ;;  %v938_v34 = vpop.eup %937 }
  0xf8   :  { %v132_v37 = vmul.f32 %v938_v34, %v130_v36 }
  0xf9   :  { %v900_v33 = vadd.f32 -1.0, %v126_v32 }
  0xfb   :  { %v133_v35 = vmul.f32 %v938_v34, %v900_v33 }
  0xfd   :  { %135 = vrot.lane.b32.xlu0 %v133_v35, %s1012_s9 }
 0x16f   :  { %v136_v38 = vpop.permute.xlu0 %135 }
 0x170   :  { %v138_v39 = vadd.f32 %v136_v38, %v132_v37 }
 0x172   :  { %939 = vtanh.f32 %v138_v39 }
 0x17f   :  { %v940_v40 = vpop.eup %939 }
 0x180   :  { %v140_v41 = vmul.f32 %v940_v40, %v936_v31 }
 0x182   :  { %142 = vrot.lane.b32.xlu1 %v140_v41, %s1012_s9  ;;  %148 = vst.msk [vmem:[%s1401_s4 + $0x18] sm:$0xff] %vm147_vm1, %v140_v41 }
 0x1f4   :  { %v143_v42 = vpop.permute.xlu1 %142 }
 0x1f5   :  { %146 = vst.msk [vmem:[%s1401_s4] sm:$0xff] %vm145_vm2, %v143_v42  ;;  %901 = vmatmul.mubr.msk.f32.vlgmr.msra.gmra.mxu1 %vm37_vm0, %v143_v42  ;;  %v363_v42 = vld [vmem:[%s1400_s0 + $0x30] sm:$0xff] }
 0x1f6   :  { %384 = vmatpush1.msra.mxu1 %v1046_v1  ;;  %431 = vmatprep.mubr.f32.mxu1 %v1011_v3 }
 0x1f7   :  { %385 = vmatprep.subr.mxu1 %v1051_v2 }
 0x1f8   :  { %386 = vmatpush1.msra.mxu1 %v1059_v4 }
 0x1f9   :  { %387 = vmatprep.subr.mxu1 %v1066_v5 }
 0x1fa   :  { %388 = vmatpush1.msra.mxu1 %v1073_v6 }
 0x1fb   :  { %389 = vmatprep.subr.mxu1 %v1080_v7 }
 0x1fc   :  { %390 = vmatpush1.msra.mxu1 %v1087_v8 }
 0x1fd   :  { %391 = vmatprep.subr.mxu1 %v1097_v10 }
 0x1fe   :  { %392 = vmatpush1.msra.mxu1 %v1104_v11 }
 0x1ff   :  { %393 = vmatprep.subr.mxu1 %v1111_v12 }
 0x200   :  { %394 = vmatpush1.msra.mxu1 %v1118_v13 }
 0x201   :  { %395 = vmatprep.subr.mxu1 %v1125_v14 }
 0x202   :  { %396 = vmatpush1.msra.mxu1 %v1132_v15 }
 0x203   :  { %397 = vmatprep.subr.mxu1 %v1139_v16 }
 0x204   :  { %398 = vmatpush1.msra.mxu1 %v1146_v17 }
 0x205   :  { %595 = vmatprep.subr.mxu1 %v1041_v0 }
 0x2b5   :  { %v219_v44 = vpop.f32.mrf.mxu1 }
 0x2b6   :  { %v224_v46 = vadd.f32 %v219_v44, %v149_v43  ;;  %v364_v44 = vld [vmem:[%s1400_s0 + $0x38] sm:$0xff] }
 0x2b7   :  { %v221_v47 = vpop.f32.mrf.mxu1 }
 0x2b8   :  { %v902_v48 = vmul.f32 -1.442695, %v224_v46  ;;  %v225_v49 = vadd.f32 %v221_v47, %v150_v45 }
 0x2ba   :  { %v903_v50 = vmul.f32 -1.442695, %v225_v49  ;;  %941 = vpow2.f32 %v902_v48 }
 0x2bc   :  { %943 = vpow2.f32 %v903_v50 }
 0x2c7   :  { %v942_v51 = vpop.eup %941 }
 0x2c8   :  { %v232_v54 = vadd.f32 1.0, %v942_v51 }
 0x2c9   :  { %v944_v52 = vpop.eup %943 }
 0x2ca   :  { %v233_v53 = vadd.f32 1.0, %v944_v52 }
 0x2cc   :  { %945 = vrcp.f32 %v233_v53 }
 0x2cd   :  { %947 = vrcp.f32 %v232_v54 }
 0x2d9   :  { %v946_v55 = vpop.eup %945 }
 0x2da   :  { %v238_v56 = vmul.f32 2.0, %v946_v55  ;;  %v948_v58 = vpop.eup %947 }
 0x2db   :  { %v240_v60 = vmul.f32 %v948_v58, %v138_v39 }
 0x2dc   :  { %v904_v57 = vadd.f32 -1.0, %v238_v56 }
 0x2de   :  { %v241_v59 = vmul.f32 %v948_v58, %v904_v57 }
 0x2e0   :  { %243 = vrot.lane.b32.xlu1 %v241_v59, %s1012_s9 }
 0x352   :  { %v244_v61 = vpop.permute.xlu1 %243 }
 0x353   :  { %v246_v62 = vadd.f32 %v244_v61, %v240_v60 }
 0x355   :  { %949 = vtanh.f32 %v246_v62 }
 0x362   :  { %v950_v63 = vpop.eup %949 }
 0x363   :  { %v248_v9 = vmul.f32 %v950_v63, %v946_v55 }
 0x365   :  { %252 = vrot.lane.b32.xlu0 %v248_v9, %s1012_s9  ;;  %250 = vst.msk [vmem:[%s1401_s4] sm:$0xff] %vm249_vm3, %v248_v9  ;;  %v469_v9 = vld [vmem:[%s1400_s0 + $0x40] sm:$0xff] }
 0x3d7   :  { %v253_v18 = vpop.permute.xlu0 %252 }
 0x3d8   :  { %256 = vst.msk [vmem:[%s1401_s4 + $0x18] sm:$0xff] %vm255_vm4, %v253_v18  ;;  %905 = vmatmul.mubr.msk.f32.vlgmr.msra.gmra.mxu0 %vm37_vm0, %v253_v18 }
 0x3d9   :  { %490 = vmatpush1.msra.mxu0 %v1046_v1  ;;  %537 = vmatprep.mubr.f32.mxu0 %v1011_v3 }
 0x3da   :  { %491 = vmatprep.subr.mxu0 %v1051_v2 }
 0x3db   :  { %492 = vmatpush1.msra.mxu0 %v1059_v4 }
 0x3dc   :  { %493 = vmatprep.subr.mxu0 %v1066_v5 }
 0x3dd   :  { %494 = vmatpush1.msra.mxu0 %v1073_v6 }
 0x3de   :  { %495 = vmatprep.subr.mxu0 %v1080_v7 }
 0x3df   :  { %496 = vmatpush1.msra.mxu0 %v1087_v8 }
 0x3e0   :  { %497 = vmatprep.subr.mxu0 %v1097_v10 }
 0x3e1   :  { %498 = vmatpush1.msra.mxu0 %v1104_v11 }
 0x3e2   :  { %499 = vmatprep.subr.mxu0 %v1111_v12 }
 0x3e3   :  { %500 = vmatpush1.msra.mxu0 %v1118_v13 }
 0x3e4   :  { %501 = vmatprep.subr.mxu0 %v1125_v14 }
 0x3e5   :  { %502 = vmatpush1.msra.mxu0 %v1132_v15 }
 0x3e6   :  { %503 = vmatprep.subr.mxu0 %v1139_v16 }
 0x3e7   :  { %504 = vmatpush1.msra.mxu0 %v1146_v17 }
 0x3e8   :  { %701 = vmatprep.subr.mxu0 %v1041_v0 }
 0x498   :  { %v327_v20 = vpop.f32.mrf.mxu0 }
 0x499   :  { %v332_v22 = vadd.f32 %v327_v20, %v257_v19  ;;  %v470_v19 = vld [vmem:[%s1400_s0 + $0x48] sm:$0xff] }
 0x49a   :  { %v329_v23 = vpop.f32.mrf.mxu0 }
 0x49b   :  { %v906_v24 = vmul.f32 -1.442695, %v332_v22  ;;  %v333_v25 = vadd.f32 %v329_v23, %v258_v21 }
 0x49d   :  { %v907_v26 = vmul.f32 -1.442695, %v333_v25  ;;  %951 = vpow2.f32 %v906_v24 }
 0x49f   :  { %953 = vpow2.f32 %v907_v26 }
 0x4aa   :  { %v952_v27 = vpop.eup %951 }
 0x4ab   :  { %v340_v30 = vadd.f32 1.0, %v952_v27 }
 0x4ac   :  { %v954_v28 = vpop.eup %953 }
 0x4ad   :  { %v341_v29 = vadd.f32 1.0, %v954_v28 }
 0x4af   :  { %955 = vrcp.f32 %v341_v29 }
 0x4b0   :  { %957 = vrcp.f32 %v340_v30 }
 0x4bc   :  { %v956_v31 = vpop.eup %955 }
 0x4bd   :  { %v346_v32 = vmul.f32 2.0, %v956_v31  ;;  %v958_v34 = vpop.eup %957 }
 0x4be   :  { %v348_v36 = vmul.f32 %v958_v34, %v246_v62 }
 0x4bf   :  { %v908_v33 = vadd.f32 -1.0, %v346_v32 }
 0x4c1   :  { %v349_v35 = vmul.f32 %v958_v34, %v908_v33 }
 0x4c3   :  { %351 = vrot.lane.b32.xlu1 %v349_v35, %s1012_s9 }
 0x535   :  { %v352_v37 = vpop.permute.xlu1 %351 }
 0x536   :  { %v354_v38 = vadd.f32 %v352_v37, %v348_v36 }
 0x538   :  { %959 = vtanh.f32 %v354_v38 }
 0x545   :  { %v960_v39 = vpop.eup %959 }
 0x546   :  { %v356_v40 = vmul.f32 %v960_v39, %v956_v31 }
 0x548   :  { %358 = vrot.lane.b32.xlu0 %v356_v40, %s1012_s9  ;;  %362 = vst.msk [vmem:[%s1401_s4 + $0x10] sm:$0xff] %vm147_vm1, %v356_v40 }
 0x5ba   :  { %v359_v41 = vpop.permute.xlu0 %358 }
 0x5bb   :  { %361 = vst.msk [vmem:[%s1401_s4 + $0x8] sm:$0xff] %vm145_vm2, %v359_v41  ;;  %909 = vmatmul.mubr.msk.f32.vlgmr.msra.gmra.mxu1 %vm37_vm0, %v359_v41 }
 0x5bc   :  { %596 = vmatpush1.msra.mxu1 %v1046_v1  ;;  %643 = vmatprep.mubr.f32.mxu1 %v1011_v3 }
 0x5bd   :  { %597 = vmatprep.subr.mxu1 %v1051_v2 }
 0x5be   :  { %598 = vmatpush1.msra.mxu1 %v1059_v4 }
 0x5bf   :  { %599 = vmatprep.subr.mxu1 %v1066_v5 }
 0x5c0   :  { %600 = vmatpush1.msra.mxu1 %v1073_v6 }
 0x5c1   :  { %601 = vmatprep.subr.mxu1 %v1080_v7 }
 0x5c2   :  { %602 = vmatpush1.msra.mxu1 %v1087_v8 }
 0x5c3   :  { %603 = vmatprep.subr.mxu1 %v1097_v10 }
 0x5c4   :  { %604 = vmatpush1.msra.mxu1 %v1104_v11 }
 0x5c5   :  { %605 = vmatprep.subr.mxu1 %v1111_v12 }
 0x5c6   :  { %606 = vmatpush1.msra.mxu1 %v1118_v13 }
 0x5c7   :  { %607 = vmatprep.subr.mxu1 %v1125_v14 }
 0x5c8   :  { %608 = vmatpush1.msra.mxu1 %v1132_v15 }
 0x5c9   :  { %609 = vmatprep.subr.mxu1 %v1139_v16 }
 0x5ca   :  { %610 = vmatpush1.msra.mxu1 %v1146_v17 }
 0x5cb   :  { %807 = vmatprep.subr.mxu1 %v1041_v0 }
 0x67b   :  { %v433_v43 = vpop.f32.mrf.mxu1 }
 0x67c   :  { %v438_v45 = vadd.f32 %v433_v43, %v363_v42 }
 0x67d   :  { %v435_v46 = vpop.f32.mrf.mxu1 }
 0x67e   :  { %v910_v47 = vmul.f32 -1.442695, %v438_v45  ;;  %v439_v48 = vadd.f32 %v435_v46, %v364_v44 }
 0x680   :  { %v911_v49 = vmul.f32 -1.442695, %v439_v48  ;;  %961 = vpow2.f32 %v910_v47  ;;  %v681_v47 = vld [vmem:[%s1400_s0 + $0x60] sm:$0xff] }
 0x682   :  { %963 = vpow2.f32 %v911_v49  ;;  %v682_v49 = vld [vmem:[%s1400_s0 + $0x68] sm:$0xff] }
 0x68d   :  { %v962_v50 = vpop.eup %961 }
 0x68e   :  { %v446_v0 = vadd.f32 1.0, %v962_v50 }
 0x68f   :  { %v964_v51 = vpop.eup %963 }
 0x690   :  { %v447_v52 = vadd.f32 1.0, %v964_v51 }
 0x692   :  { %965 = vrcp.f32 %v447_v52 }
 0x693   :  { %967 = vrcp.f32 %v446_v0 }
 0x69f   :  { %v966_v53 = vpop.eup %965 }
 0x6a0   :  { %v452_v54 = vmul.f32 2.0, %v966_v53  ;;  %v968_v56 = vpop.eup %967 }
 0x6a1   :  { %v454_v58 = vmul.f32 %v968_v56, %v354_v38 }
 0x6a2   :  { %v912_v55 = vadd.f32 -1.0, %v452_v54 }
 0x6a4   :  { %v455_v57 = vmul.f32 %v968_v56, %v912_v55 }
 0x6a6   :  { %457 = vrot.lane.b32.xlu1 %v455_v57, %s1012_s9 }
 0x718   :  { %v458_v59 = vpop.permute.xlu1 %457 }
 0x719   :  { %v460_v60 = vadd.f32 %v458_v59, %v454_v58 }
 0x71b   :  { %969 = vtanh.f32 %v460_v60 }
 0x728   :  { %v970_v61 = vpop.eup %969 }
 0x729   :  { %v462_v62 = vmul.f32 %v970_v61, %v966_v53 }
 0x72b   :  { %465 = vrot.lane.b32.xlu0 %v462_v62, %s1012_s9  ;;  %463 = vst.msk [vmem:[%s1401_s4 + $0x8] sm:$0xff] %vm249_vm3, %v462_v62 }
 0x79d   :  { %v466_v63 = vpop.permute.xlu0 %465 }
 0x79e   :  { %468 = vst.msk [vmem:[%s1401_s4 + $0x10] sm:$0xff] %vm255_vm4, %v466_v63  ;;  %913 = vmatmul.mubr.msk.f32.vlgmr.msra.gmra.mxu0 %vm37_vm0, %v466_v63 }
 0x79f   :  { %702 = vmatpush1.msra.mxu0 %v1046_v1  ;;  %749 = vmatprep.mubr.f32.mxu0 %v1011_v3 }
 0x7a0   :  { %703 = vmatprep.subr.mxu0 %v1051_v2 }
 0x7a1   :  { %704 = vmatpush1.msra.mxu0 %v1059_v4 }
 0x7a2   :  { %705 = vmatprep.subr.mxu0 %v1066_v5 }
 0x7a3   :  { %706 = vmatpush1.msra.mxu0 %v1073_v6 }
 0x7a4   :  { %707 = vmatprep.subr.mxu0 %v1080_v7 }
 0x7a5   :  { %708 = vmatpush1.msra.mxu0 %v1087_v8 }
 0x7a6   :  { %709 = vmatprep.subr.mxu0 %v1097_v10 }
 0x7a7   :  { %710 = vmatpush1.msra.mxu0 %v1104_v11 }
 0x7a8   :  { %711 = vmatprep.subr.mxu0 %v1111_v12 }
 0x7a9   :  { %712 = vmatpush1.msra.mxu0 %v1118_v13 }
 0x7aa   :  { %713 = vmatprep.subr.mxu0 %v1125_v14 }
 0x7ab   :  { %714 = vmatpush1.msra.mxu0 %v1132_v15 }
 0x7ac   :  { %715 = vmatprep.subr.mxu0 %v1139_v16 }
 0x7ad   :  { %716 = vmatpush1.msra.mxu0 %v1146_v17 }
 0x85e   :  { %v539_v18 = vpop.f32.mrf.mxu0 }
 0x85f   :  { %v544_v20 = vadd.f32 %v539_v18, %v469_v9 }
 0x860   :  { %v541_v21 = vpop.f32.mrf.mxu0 }
 0x861   :  { %v914_v22 = vmul.f32 -1.442695, %v544_v20  ;;  %v545_v23 = vadd.f32 %v541_v21, %v470_v19 }
 0x863   :  { %v915_v24 = vmul.f32 -1.442695, %v545_v23  ;;  %971 = vpow2.f32 %v914_v22  ;;  %v787_v22 = vld [vmem:[%s1400_s0 + $0x70] sm:$0xff] }
 0x865   :  { %973 = vpow2.f32 %v915_v24  ;;  %v788_v24 = vld [vmem:[%s1400_s0 + $0x78] sm:$0xff] }
 0x870   :  { %v972_v25 = vpop.eup %971 }
 0x871   :  { %v552_v28 = vadd.f32 1.0, %v972_v25 }
 0x872   :  { %v974_v26 = vpop.eup %973 }
 0x873   :  { %v553_v27 = vadd.f32 1.0, %v974_v26 }
 0x875   :  { %975 = vrcp.f32 %v553_v27 }
 0x876   :  { %977 = vrcp.f32 %v552_v28 }
 0x882   :  { %v976_v29 = vpop.eup %975 }
 0x883   :  { %v558_v30 = vmul.f32 2.0, %v976_v29  ;;  %v978_v32 = vpop.eup %977 }
 0x884   :  { %v560_v34 = vmul.f32 %v978_v32, %v460_v60 }
 0x885   :  { %v916_v31 = vadd.f32 -1.0, %v558_v30 }
 0x887   :  { %v561_v33 = vmul.f32 %v978_v32, %v916_v31 }
 0x889   :  { %563 = vrot.lane.b32.xlu1 %v561_v33, %s1012_s9 }
 0x8fb   :  { %v564_v35 = vpop.permute.xlu1 %563 }
 0x8fc   :  { %v566_v36 = vadd.f32 %v564_v35, %v560_v34 }
 0x8fe   :  { %979 = vtanh.f32 %v566_v36 }
 0x90b   :  { %v980_v37 = vpop.eup %979 }
 0x90c   :  { %v568_v38 = vmul.f32 %v980_v37, %v976_v29 }
 0x90e   :  { %570 = vrot.lane.b32.xlu0 %v568_v38, %s1012_s9  ;;  %574 = vst.msk [vmem:[%s1401_s4 + $0x8] sm:$0xff] %vm147_vm1, %v568_v38 }
 0x980   :  { %v571_v39 = vpop.permute.xlu0 %570 }
 0x981   :  { %573 = vst.msk [vmem:[%s1401_s4 + $0x10] sm:$0xff] %vm145_vm2, %v571_v39  ;;  %917 = vmatmul.mubr.msk.f32.vlgmr.msra.gmra.mxu1 %vm37_vm0, %v571_v39 }
 0x982   :  { %808 = vmatpush1.msra.mxu1 %v1046_v1  ;;  %855 = vmatprep.mubr.f32.mxu1 %v1011_v3  ;;  %v575_v1 = vld [vmem:[%s1400_s0 + $0x50] sm:$0xff]  ;;  %v576_v3 = vld [vmem:[%s1400_s0 + $0x58] sm:$0xff] }
 0x983   :  { %809 = vmatprep.subr.mxu1 %v1051_v2 }
 0x984   :  { %810 = vmatpush1.msra.mxu1 %v1059_v4 }
 0x985   :  { %811 = vmatprep.subr.mxu1 %v1066_v5 }
 0x986   :  { %812 = vmatpush1.msra.mxu1 %v1073_v6 }
 0x987   :  { %813 = vmatprep.subr.mxu1 %v1080_v7 }
 0x988   :  { %814 = vmatpush1.msra.mxu1 %v1087_v8 }
 0x989   :  { %815 = vmatprep.subr.mxu1 %v1097_v10 }
 0x98a   :  { %816 = vmatpush1.msra.mxu1 %v1104_v11 }
 0x98b   :  { %817 = vmatprep.subr.mxu1 %v1111_v12 }
 0x98c   :  { %818 = vmatpush1.msra.mxu1 %v1118_v13 }
 0x98d   :  { %819 = vmatprep.subr.mxu1 %v1125_v14 }
 0x98e   :  { %820 = vmatpush1.msra.mxu1 %v1132_v15 }
 0x98f   :  { %821 = vmatprep.subr.mxu1 %v1139_v16 }
 0x990   :  { %822 = vmatpush1.msra.mxu1 %v1146_v17 }
 0xa41   :  { %v645_v2 = vpop.f32.mrf.mxu1 }
 0xa42   :  { %v650_v4 = vadd.f32 %v645_v2, %v575_v1 }
 0xa43   :  { %v647_v5 = vpop.f32.mrf.mxu1 }
 0xa44   :  { %v918_v6 = vmul.f32 -1.442695, %v650_v4  ;;  %v651_v7 = vadd.f32 %v647_v5, %v576_v3 }
 0xa46   :  { %v919_v8 = vmul.f32 -1.442695, %v651_v7  ;;  %981 = vpow2.f32 %v918_v6 }
 0xa48   :  { %983 = vpow2.f32 %v919_v8 }
 0xa53   :  { %v982_v10 = vpop.eup %981 }
 0xa54   :  { %v658_v13 = vadd.f32 1.0, %v982_v10 }
 0xa55   :  { %v984_v11 = vpop.eup %983 }
 0xa56   :  { %v659_v12 = vadd.f32 1.0, %v984_v11 }
 0xa58   :  { %985 = vrcp.f32 %v659_v12 }
 0xa59   :  { %987 = vrcp.f32 %v658_v13 }
 0xa65   :  { %v986_v14 = vpop.eup %985 }
 0xa66   :  { %v664_v15 = vmul.f32 2.0, %v986_v14  ;;  %v988_v17 = vpop.eup %987 }
 0xa67   :  { %v666_v41 = vmul.f32 %v988_v17, %v566_v36 }
 0xa68   :  { %v920_v16 = vadd.f32 -1.0, %v664_v15 }
 0xa6a   :  { %v667_v40 = vmul.f32 %v988_v17, %v920_v16 }
 0xa6c   :  { %669 = vrot.lane.b32.xlu1 %v667_v40, %s1012_s9 }
 0xade   :  { %v670_v42 = vpop.permute.xlu1 %669 }
 0xadf   :  { %v672_v43 = vadd.f32 %v670_v42, %v666_v41 }
 0xae1   :  { %989 = vtanh.f32 %v672_v43 }
 0xaee   :  { %v990_v44 = vpop.eup %989 }
 0xaef   :  { %v674_v45 = vmul.f32 %v990_v44, %v986_v14 }
 0xaf1   :  { %677 = vrot.lane.b32.xlu0 %v674_v45, %s1012_s9  ;;  %675 = vst.msk [vmem:[%s1401_s4 + $0x10] sm:$0xff] %vm249_vm3, %v674_v45 }
 0xb63   :  { %v678_v46 = vpop.permute.xlu0 %677 }
 0xb64   :  { %680 = vst.msk [vmem:[%s1401_s4 + $0x8] sm:$0xff] %vm255_vm4, %v678_v46  ;;  %921 = vmatmul.mubr.msk.f32.vlgmr.msra.gmra.mxu0 %vm37_vm0, %v678_v46 }
 0xc24   :  { %v751_v48 = vpop.f32.mrf.mxu0 }
 0xc25   :  { %v756_v50 = vadd.f32 %v751_v48, %v681_v47 }
 0xc26   :  { %v753_v51 = vpop.f32.mrf.mxu0 }
 0xc27   :  { %v922_v52 = vmul.f32 -1.442695, %v756_v50  ;;  %v757_v0 = vadd.f32 %v753_v51, %v682_v49 }
 0xc29   :  { %v923_v53 = vmul.f32 -1.442695, %v757_v0  ;;  %991 = vpow2.f32 %v922_v52 }
 0xc2b   :  { %993 = vpow2.f32 %v923_v53 }
 0xc36   :  { %v992_v54 = vpop.eup %991 }
 0xc37   :  { %v764_v57 = vadd.f32 1.0, %v992_v54 }
 0xc38   :  { %v994_v55 = vpop.eup %993 }
 0xc39   :  { %v765_v56 = vadd.f32 1.0, %v994_v55 }
 0xc3b   :  { %995 = vrcp.f32 %v765_v56 }
 0xc3c   :  { %997 = vrcp.f32 %v764_v57 }
 0xc48   :  { %v996_v58 = vpop.eup %995 }
 0xc49   :  { %v770_v59 = vmul.f32 2.0, %v996_v58  ;;  %v998_v61 = vpop.eup %997 }
 0xc4a   :  { %v772_v63 = vmul.f32 %v998_v61, %v672_v43 }
 0xc4b   :  { %v924_v60 = vadd.f32 -1.0, %v770_v59 }
 0xc4d   :  { %v773_v62 = vmul.f32 %v998_v61, %v924_v60 }
 0xc4f   :  { %775 = vrot.lane.b32.xlu1 %v773_v62, %s1012_s9 }
 0xcc1   :  { %v776_v9 = vpop.permute.xlu1 %775 }
 0xcc2   :  { %v778_v18 = vadd.f32 %v776_v9, %v772_v63 }
 0xcc4   :  { %999 = vtanh.f32 %v778_v18 }
 0xcd1   :  { %v1000_v19 = vpop.eup %999 }
 0xcd2   :  { %v780_v20 = vmul.f32 %v1000_v19, %v996_v58 }
 0xcd4   :  { %782 = vrot.lane.b32.xlu0 %v780_v20, %s1012_s9  ;;  %786 = vst.msk [vmem:[%s1401_s4] sm:$0xff] %vm147_vm1, %v780_v20 }
 0xd46   :  { %v783_v21 = vpop.permute.xlu0 %782 }
 0xd47   :  { %785 = vst.msk [vmem:[%s1401_s4 + $0x18] sm:$0xff] %vm145_vm2, %v783_v21  ;;  %925 = vmatmul.mubr.msk.f32.vlgmr.msra.gmra.mxu1 %vm37_vm0, %v783_v21 }
 0xe07   :  { %v857_v23 = vpop.f32.mrf.mxu1 }
 0xe08   :  { %v862_v25 = vadd.f32 %v857_v23, %v787_v22 }
 0xe09   :  { %v859_v26 = vpop.f32.mrf.mxu1 }
 0xe0a   :  { %v926_v27 = vmul.f32 -1.442695, %v862_v25  ;;  %v863_v28 = vadd.f32 %v859_v26, %v788_v24 }
 0xe0c   :  { %v927_v29 = vmul.f32 -1.442695, %v863_v28  ;;  %1001 = vpow2.f32 %v926_v27 }
 0xe0e   :  { %1003 = vpow2.f32 %v927_v29 }
 0xe19   :  { %v1002_v30 = vpop.eup %1001 }
 0xe1a   :  { %v870_v33 = vadd.f32 1.0, %v1002_v30 }
 0xe1b   :  { %v1004_v31 = vpop.eup %1003 }
 0xe1c   :  { %v871_v32 = vadd.f32 1.0, %v1004_v31 }
 0xe1e   :  { %1005 = vrcp.f32 %v871_v32 }
 0xe1f   :  { %1007 = vrcp.f32 %v870_v33 }
 0xe2b   :  { %v1006_v34 = vpop.eup %1005 }
 0xe2c   :  { %v876_v35 = vmul.f32 2.0, %v1006_v34  ;;  %v1008_v37 = vpop.eup %1007 }
 0xe2d   :  { %v878_v39 = vmul.f32 %v1008_v37, %v778_v18 }
 0xe2e   :  { %v928_v36 = vadd.f32 -1.0, %v876_v35 }
 0xe30   :  { %v879_v38 = vmul.f32 %v1008_v37, %v928_v36 }
 0xe32   :  { %881 = vrot.lane.b32.xlu1 %v879_v38, %s1012_s9 }
 0xea4   :  { %v882_v1 = vpop.permute.xlu1 %881 }
 0xea5   :  { %v884_v2 = vadd.f32 %v882_v1, %v878_v39 }
 0xea7   :  { %1009 = vtanh.f32 %v884_v2 }
 0xeb4   :  { %v1010_v3 = vpop.eup %1009 }
 0xeb5   :  { %v886_v4 = vmul.f32 %v1010_v3, %v1006_v34 }
 0xeb7   :  { %889 = vrot.lane.b32.xlu0 %v886_v4, %s1012_s9  ;;  %887 = vst.msk [vmem:[%s1401_s4 + $0x18] sm:$0xff] %vm249_vm3, %v886_v4 }
 0xf29   :  { %v890_v5 = vpop.permute.xlu0 %889 }
 0xf2a   :  { %892 = vst.msk [vmem:[%s1401_s4] sm:$0xff] %vm255_vm4, %v890_v5 }

</bundles_post_ra>
